<compile_context>
chip_gen: v6e
topology: v6e:2x2x1
jax: 0.10.0
libtpu: 0.0.40
codegen_flags: <defaults>
</compile_context>

<pallas_src>
import functools

import jax
import jax.numpy as jnp
from jax.experimental import pallas as pl
from jax.experimental.pallas import tpu as pltpu

_SOFTPLUS_THRESHOLD = 20.0            # matches torch.nn.functional.softplus default
_TARGET_BLOCK_BYTES = 2 * 1024 * 1024  # per-buffer block; x4 live with double-buffered in+out


def _soft_upper_bound_kernel(x_ref, o_ref, *, upper_bound: float):
    # Load in native dtype, do the transcendental math in f32, store in native dtype.
    x = x_ref[...].astype(jnp.float32)
    z = upper_bound - x
    # Thresholded softplus, identical semantics to torch's default softplus.
    z_safe = jnp.minimum(z, _SOFTPLUS_THRESHOLD)           # avoid exp overflow
    sp = jnp.where(z > _SOFTPLUS_THRESHOLD, z, jnp.log1p(jnp.exp(z_safe)))
    o_ref[...] = (upper_bound - sp).astype(o_ref.dtype)


def _pick_lane(n: int) -> int:
    for lane in (1024, 512, 256, 128):
        if n % lane == 0:
            return lane
    return 128  # will require a (small) pad to a multiple of 128


def soft_upper_bound(x: jax.Array, upper_bound: float) -> jax.Array:
    """Pallas TPU implementation of SoftUpperBound.forward (native-dtype I/O)."""
    orig_shape = x.shape
    dtype = x.dtype
    n = x.size

    lane = _pick_lane(n)
    n_pad = pl.cdiv(n, lane) * lane

    flat = x.reshape(-1)
    padded = n_pad != n
    if padded:
        # Rare path: only when the element count isn't a multiple of 128.
        flat = jnp.pad(flat, (0, n_pad - n))

    rows = n_pad // lane
    x2 = flat.reshape(rows, lane)  # lane-dense slab; free reshape when not padded

    itemsize = jnp.dtype(dtype).itemsize
    # ~2 MiB per block (rounded down to a multiple of 8 rows), clamped to the array.
    max_rows = max(8, (_TARGET_BLOCK_BYTES // (lane * itemsize)) // 8 * 8)
    block_rows = min(max_rows, rows)
    grid = (pl.cdiv(rows, block_rows),)

    out2 = pl.pallas_call(
        functools.partial(_soft_upper_bound_kernel, upper_bound=float(upper_bound)),
        out_shape=jax.ShapeDtypeStruct((rows, lane), dtype),
        grid=grid,
        in_specs=[pl.BlockSpec((block_rows, lane), lambda i: (i, 0))],
        out_specs=pl.BlockSpec((block_rows, lane), lambda i: (i, 0)),
        compiler_params=pltpu.CompilerParams(dimension_semantics=("parallel",)),
    )(x2)

    if padded:
        return out2.reshape(-1)[:n].reshape(orig_shape)
    return out2.reshape(orig_shape)


def _reference(x, upper_bound):
    """Pure-JAX reference in f32 (same thresholded softplus as torch default)."""
    xf = x.astype(jnp.float32)
    z = upper_bound - xf
    sp = jnp.where(z > _SOFTPLUS_THRESHOLD, z,
                   jnp.log1p(jnp.exp(jnp.minimum(z, _SOFTPLUS_THRESHOLD))))
    return upper_bound - sp


if __name__ == "__main__":
    key = jax.random.PRNGKey(0)
    upper_bound = 1.5

    # Primary test: small NCHW-like f32 input (typical cleandiffuser usage).
    x = jax.random.normal(key, (2, 4, 16, 16), dtype=jnp.float32) * 5.0
    y = jax.block_until_ready(soft_upper_bound(x, upper_bound))
    y_ref = _reference(x, upper_bound)
    assert y.shape == x.shape and y.dtype == x.dtype
    assert jnp.allclose(y, y_ref, atol=1e-5, rtol=1e-5)

    # Native bf16 I/O path (math in f32 inside the kernel, cast on store).
    xb = (jax.random.normal(jax.random.PRNGKey(1), (2, 4, 16, 16)) * 5.0).astype(jnp.bfloat16)
    yb = jax.block_until_ready(soft_upper_bound(xb, upper_bound))
    yb_ref = _reference(xb, upper_bound).astype(jnp.bfloat16)
    assert yb.shape == xb.shape and yb.dtype == xb.dtype
    assert jnp.allclose(yb.astype(jnp.float32), yb_ref.astype(jnp.float32), atol=2e-2, rtol=2e-2)

    # Misaligned-size path (exercises the small pad/slice fallback).
    xm = jax.random.normal(jax.random.PRNGKey(2), (3, 5, 7), dtype=jnp.float32) * 5.0
    ym = jax.block_until_ready(soft_upper_bound(xm, upper_bound))
    assert ym.shape == xm.shape
    assert jnp.allclose(ym, _reference(xm, upper_bound), atol=1e-5, rtol=1e-5)

    print("KERNEL_OK")
</pallas_src>

<mosaic_0001>
module attributes {stable_mosaic.version = 11 : i64} {
  func.func @_soft_upper_bound_kernel(%arg0: i32, %arg1: memref<2x1024xf32, #tpu.memory_space<vmem>>, %arg2: memref<2x1024xf32, #tpu.memory_space<vmem>>) attributes {dimension_semantics = [#tpu.dimension_semantics<parallel>], iteration_bounds = array<i64: 1>, scalar_prefetch = 0 : i64, scratch_operands = 0 : i64, tpu.core_type = #tpu.core_type<tc>, window_params = [{transform_indices = @transform_0, window_bounds = array<i64: 2, 1024>}, {transform_indices = @transform_1, window_bounds = array<i64: 2, 1024>}]} {
    %c0 = arith.constant 0 : index
    %c0_0 = arith.constant 0 : index
    %0 = vector.load %arg1[%c0, %c0_0] : memref<2x1024xf32, #tpu.memory_space<vmem>>, vector<2x1024xf32>
    %cst = arith.constant 1.500000e+00 : f32
    %1 = vector.broadcast %cst : f32 to vector<2x1024xf32>
    %2 = arith.subf %1, %0 : vector<2x1024xf32>
    %cst_1 = arith.constant 2.000000e+01 : f32
    %3 = vector.broadcast %cst_1 : f32 to vector<2x1024xf32>
    %4 = arith.minimumf %2, %3 : vector<2x1024xf32>
    %cst_2 = arith.constant 2.000000e+01 : f32
    %5 = vector.broadcast %cst_2 : f32 to vector<2x1024xf32>
    %6 = arith.cmpf ogt, %2, %5 : vector<2x1024xf32>
    %7 = math.exp %4 : vector<2x1024xf32>
    %8 = math.log1p %7 : vector<2x1024xf32>
    %9 = arith.select %6, %2, %8 : vector<2x1024xi1>, vector<2x1024xf32>
    %cst_3 = arith.constant 1.500000e+00 : f32
    %10 = vector.broadcast %cst_3 : f32 to vector<2x1024xf32>
    %11 = arith.subf %10, %9 : vector<2x1024xf32>
    %c0_4 = arith.constant 0 : index
    %c0_5 = arith.constant 0 : index
    %12 = vector.load %arg2[%c0_4, %c0_5] : memref<2x1024xf32, #tpu.memory_space<vmem>>, vector<2x1024xf32>
    tpu.vector_store %arg2[%c0_4, %c0_5], %11 {strides = array<i32>} : memref<2x1024xf32, #tpu.memory_space<vmem>>, vector<2x1024xf32>,
    return
  }
  func.func @transform_0(%arg0: i32) -> (i32, i32) {
    %c0_i32 = arith.constant 0 : i32
    %c0_i32_0 = arith.constant 0 : i32
    return %arg0, %c0_i32 : i32, i32
  }
  func.func @transform_1(%arg0: i32) -> (i32, i32) {
    %c0_i32 = arith.constant 0 : i32
    %c0_i32_0 = arith.constant 0 : i32
    return %arg0, %c0_i32 : i32, i32
  }
}

</mosaic_0001>

<bundles_post_ra>
// kernel: tpu_custom_call.1
= control target key start
LH: loop header
LB: loop body
LE: loop exit
PB: predicated region body
PF: predicated region fallthrough
CT: control target
= control target key end

     0   :  { %6 = vsyncpa [#allocation3], 0  ;;  %s144_s0 = inlined_call_operand.hbm [shape: f32[2,1024], index: 0, kind: input, shape index: {}]   ;;  %s145_s1 = inlined_call_operand.hbm [shape: f32[2,1024], index: 1, kind: output, shape index: {}]  }
   0x1   :  { %7 = vsyncpa [#allocation4], 0  ;;  %s126_s6 = smov [#allocation2]  }
   0x2   :  { %s14_s7 = sshll.u32 %s126_s6, 4  ;;  %s15_s7 = int_to_ptr.vmem [resolvable:$true] %s14_s7 }
   0x3   :  { %s90_s8 = scalar_lea.vmem %s15_s7, 256  ;;  %p95_p1 = scmp.lt.s32.totalorder %s15_s7, %s15_s7 }
   0x4   :  { %p91_p0 = scmp.ne.s32.totalorder %s15_s7, %s90_s8  ;;  %p96_p2 = scmp.lt.s32.totalorder %s90_s8, %s90_s8 }
   0x6   :  { %p97_p3 = por %p96_p2, %p95_p1 }
   0x8   :  { %p98_p4 = pnand %p97_p3, %p91_p0 }
   0xa   :  { %101 = shalt.err (!%p98_p4)
}
   0xb   :  { %17 = dma.hbm_to_vmem [thread:$0]  %s144_s0, 256, %s15_s7, [#allocation3]  }
   0xc   :  { %122 = dma.done.wait [#allocation3], 256  }
   0xd   :  { %123 = vsyncadd [#allocation3], 4294967040  ;;  %v21_v0 = vld [vmem:[#allocation2] sm:$0xff]  ;;  %v22_v1 = vld [vmem:[#allocation2 + $0x8] sm:$0xff]  ;;  %s127_s0 = smov [#allocation5]  }
   0xe   :  { %v23_v2 = vsub.f32 1.5, %v21_v0  ;;  %v24_v3 = vsub.f32 1.5, %v22_v1  ;;  %s63_s11 = sshll.u32 %s127_s0, 4  ;;  %s64_s11 = int_to_ptr.vmem [resolvable:$true] %s63_s11 }
   0xf   :  { %s102_s12 = scalar_lea.vmem %s64_s11, 256  ;;  %p107_p6 = scmp.lt.s32.totalorder %s64_s11, %s64_s11 }
  0x10   :  { %v25_v4 = vmin.f32 %v23_v2, 20.0  ;;  %v26_v5 = vmin.f32 %v24_v3, 20.0  ;;  %vm27_vm1 = vcmp.gt.f32.partialorder %v23_v2, 20.0  ;;  %vm28_vm3 = vcmp.gt.f32.partialorder %v24_v3, 20.0  ;;  %p103_p5 = scmp.ne.s32.totalorder %s64_s11, %s102_s12  ;;  %p108_p7 = scmp.lt.s32.totalorder %s102_s12, %s102_s12 }
  0x12   :  { %v29_v6 = vmul.f32 1.442695, %v25_v4  ;;  %v31_v7 = vmul.f32 1.442695, %v26_v5  ;;  %p109_p8 = por %p108_p7, %p107_p6 }
  0x14   :  { %74 = vpow2.f32 %v29_v6  ;;  %p110_p9 = pnand %p109_p8, %p103_p5 }
  0x15   :  { %76 = vpow2.f32 %v31_v7 }
  0x21   :  { %v75_v8 = vpop.eup %74 }
  0x22   :  { %v77_v9 = vpop.eup %76  ;;  %v33_v10 = vadd.f32 1.0, %v75_v8  ;;  %v36_v12 = vmul.f32 -0.5, %v75_v8  ;;  %v39_v15 = vand.u32 2147483647, %v75_v8 }
  0x23   :  { %v42_v11 = vadd.f32 1.0, %v77_v9  ;;  %v45_v13 = vmul.f32 -0.5, %v77_v9  ;;  %v48_v17 = vand.u32 2147483647, %v77_v9 }
  0x24   :  { %78 = vlog2.f32 %v33_v10  ;;  %v37_v14 = vadd.f32 1.0, %v36_v12  ;;  %vm40_vm0 = vcmp.lt.f32.partialorder %v39_v15, 0.0004427343 }
  0x25   :  { %80 = vlog2.f32 %v42_v11  ;;  %v46_v16 = vadd.f32 1.0, %v45_v13  ;;  %vm49_vm2 = vcmp.lt.f32.partialorder %v48_v17, 0.0004427343 }
  0x26   :  { %v38_v18 = vmul.f32 %v75_v8, %v37_v14 }
  0x27   :  { %v47_v20 = vmul.f32 %v77_v9, %v46_v16 }
  0x31   :  { %v79_v19 = vpop.eup %78 }
  0x32   :  { %v81_v21 = vpop.eup %80  ;;  %v35_v22 = vmul.f32 0.6931472, %v79_v19 }
  0x33   :  { %v44_v23 = vmul.f32 0.6931472, %v81_v21 }
  0x34   :  { %v41_v24 = vsel %vm40_vm0, %v38_v18, %v35_v22 }
  0x35   :  { %v51_v25 = vsel %vm27_vm1, %v23_v2, %v41_v24  ;;  %v50_v26 = vsel %vm49_vm2, %v47_v20, %v44_v23 }
  0x36   :  { %v53_v27 = vsub.f32 1.5, %v51_v25  ;;  %v52_v28 = vsel %vm28_vm3, %v24_v3, %v50_v26 }
  0x37   :  { %v54_v29 = vsub.f32 1.5, %v52_v28 }
  0x38   :  { %55 = vst [vmem:[#allocation5] sm:$0xff] %v53_v27 }
  0x39   :  { %56 = vst [vmem:[#allocation5 + $0x8] sm:$0xff] %v54_v29 }
  0x3a   :  { %113 = shalt.err (!%p110_p9)
}
  0x3b   :  { %66 = dma.vmem_to_hbm [thread:$0]  %s64_s11, 256, %s145_s1, [#allocation4]  }
  0x3c   :  { %124 = dma.done.wait [#allocation4], 256  }
  0x3d   :  { %125 = vsyncadd [#allocation4], 4294967040 }
  0x3e   :  { %70 = vsyncpa [#allocation3], 1 }
  0x3f   :  { %71 = vsyncpa [#allocation4], 1 }

</bundles_post_ra>
